<compile_context>
chip_gen: v5e
topology: v5e:2x2
jax: 0.10.0
libtpu: 0.0.40
codegen_flags: <defaults>
</compile_context>

<pallas_src>
import functools

import jax
import jax.numpy as jnp
from jax.experimental import pallas as pl
from jax.experimental.pallas import tpu as pltpu


# ----------------------------------------------------------------------------
# Kernel
# ----------------------------------------------------------------------------
def _utility_kernel(obs_i_ref, obs_o_ref,
                    w1a_ref, w1b_ref, b1_ref,
                    w2_ref, b2_ref,
                    w3_ref, b3_ref,
                    out_ref, *, matmul_dtype):
    # fc1 (split-weight fused concat) + relu ; cast activations in-kernel.
    xi = obs_i_ref[...].astype(matmul_dtype)
    xo = obs_o_ref[...].astype(matmul_dtype)
    h1 = (jnp.dot(xi, w1a_ref[...], preferred_element_type=jnp.float32)
          + jnp.dot(xo, w1b_ref[...], preferred_element_type=jnp.float32)
          + b1_ref[...])
    h1 = jnp.maximum(h1, 0.0)

    # fc2 + relu
    h2 = (jnp.dot(h1.astype(matmul_dtype), w2_ref[...],
                  preferred_element_type=jnp.float32)
          + b2_ref[...])
    h2 = jnp.maximum(h2, 0.0)

    # fc3 (raw utilities, no activation); narrow (8-lane) f32 writeback.
    out_ref[...] = (jnp.dot(h2.astype(matmul_dtype), w3_ref[...],
                            preferred_element_type=jnp.float32)
                    + b3_ref[...])


# ----------------------------------------------------------------------------
# Wrapper
# ----------------------------------------------------------------------------
def _round_up(x, m):
    return ((x + m - 1) // m) * m


def _pad2d(a, rows, cols):
    return jnp.pad(a, ((0, rows - a.shape[0]), (0, cols - a.shape[1])))


def utility_forward(obs_i, obs_others, params, *,
                    tile_b=1024, matmul_dtype=jnp.bfloat16):
    """obs_i, obs_others: (B, obs_shape) float32.

    Returns (B, n_actions) float32 utilities (== fc3 output of the torch module).
    """
    B, obs_shape = obs_i.shape
    hidden = params["w1"].shape[1]
    n_actions = params["w3"].shape[1]

    HP = _round_up(hidden, 128)      # lane-dense hidden intermediates (exact)
    AP = _round_up(n_actions, 8)     # narrow output: 16x fewer HBM bytes vs 128

    # One-time, tiny weight prep: split fc1 weight so obs_i / obs_others stream
    # straight into the kernel; zero-pad hidden/action dims; cast weights once.
    w1 = params["w1"]
    w1a = _pad2d(w1[:obs_shape], obs_shape, HP).astype(matmul_dtype)
    w1b = _pad2d(w1[obs_shape:], obs_shape, HP).astype(matmul_dtype)
    b1 = _pad2d(params["b1"], 1, HP).astype(jnp.float32)
    w2 = _pad2d(params["w2"], HP, HP).astype(matmul_dtype)
    b2 = _pad2d(params["b2"], 1, HP).astype(jnp.float32)
    w3 = _pad2d(params["w3"], HP, AP).astype(matmul_dtype)
    b3 = _pad2d(params["b3"], 1, AP).astype(jnp.float32)

    # Batch tile: 8-row aligned, capped at tile_b, and chosen so the grid has
    # >= 2 steps whenever the batch allows it (v7x: shard across 2 TCs).
    half = _round_up(max(1, pl.cdiv(B, 2)), 8)
    TILE_B = max(8, min(_round_up(tile_b, 8), half))
    grid = (pl.cdiv(B, TILE_B),)     # partial last block handled by Pallas

    resident = lambda shape: pl.BlockSpec(shape, lambda i: (0, 0))

    out = pl.pallas_call(
        functools.partial(_utility_kernel, matmul_dtype=matmul_dtype),
        out_shape=jax.ShapeDtypeStruct((B, AP), jnp.float32),
        grid=grid,
        in_specs=[
            pl.BlockSpec((TILE_B, obs_shape), lambda i: (i, 0)),  # obs_i
            pl.BlockSpec((TILE_B, obs_shape), lambda i: (i, 0)),  # obs_others
            resident((obs_shape, HP)),                            # w1 (top)
            resident((obs_shape, HP)),                            # w1 (bottom)
            resident((1, HP)),                                    # b1
            resident((HP, HP)),                                   # w2
            resident((1, HP)),                                    # b2
            resident((HP, AP)),                                   # w3
            resident((1, AP)),                                    # b3
        ],
        out_specs=pl.BlockSpec((TILE_B, AP), lambda i: (i, 0)),
        compiler_params=pltpu.CompilerParams(
            dimension_semantics=("parallel",)),
    )(obs_i, obs_others, w1a, w1b, b1, w2, b2, w3, b3)

    if AP == n_actions:
        return out
    return out[:, :n_actions]


# ----------------------------------------------------------------------------
# Params / reference
# ----------------------------------------------------------------------------
def init_params(key, obs_shape, n_actions, hidden=64):
    """Deterministic synthetic params. Weights stored as (in, out)."""
    ks = jax.random.split(key, 6)
    scale = 0.1
    return {
        "w1": scale * jax.random.normal(ks[0], (obs_shape * 2, hidden), jnp.float32),
        "b1": scale * jax.random.normal(ks[1], (1, hidden), jnp.float32),
        "w2": scale * jax.random.normal(ks[2], (hidden, hidden), jnp.float32),
        "b2": scale * jax.random.normal(ks[3], (1, hidden), jnp.float32),
        "w3": scale * jax.random.normal(ks[4], (hidden, n_actions), jnp.float32),
        "b3": scale * jax.random.normal(ks[5], (1, n_actions), jnp.float32),
    }


def _reference(obs_i, obs_others, params):
    x = jnp.concatenate([obs_i, obs_others], axis=-1)
    h1 = jax.nn.relu(x @ params["w1"] + params["b1"])
    h2 = jax.nn.relu(h1 @ params["w2"] + params["b2"])
    return h2 @ params["w3"] + params["b3"]


# ----------------------------------------------------------------------------
# Demo / self-test
# ----------------------------------------------------------------------------
if __name__ == "__main__":
    key = jax.random.PRNGKey(0)
    k_obs_i, k_obs_o, k_params = jax.random.split(key, 3)

    batch = 8
    obs_shape = 16    # args.obs_shape
    n_actions = 5     # args.n_actions

    obs_i = jax.random.normal(k_obs_i, (batch, obs_shape), jnp.float32)
    obs_others = jax.random.normal(k_obs_o, (batch, obs_shape), jnp.float32)
    params = init_params(k_params, obs_shape, n_actions)

    ref = _reference(obs_i, obs_others, params)

    # Default bf16-MXU path (f32 accumulation / bias / relu).
    out = jax.block_until_ready(utility_forward(obs_i, obs_others, params))
    assert out.shape == (batch, n_actions)
    assert jnp.allclose(out, ref, atol=5e-2, rtol=5e-2)

    # Exact f32 path.
    out_f32 = jax.block_until_ready(
        utility_forward(obs_i, obs_others, params, matmul_dtype=jnp.float32))
    assert out_f32.shape == (batch, n_actions)
    assert jnp.allclose(out_f32, ref, atol=1e-5, rtol=1e-5)

    # Multi-step grid with a ragged (partial) last batch tile.
    k2i, k2o = jax.random.split(jax.random.PRNGKey(1))
    obs_i2 = jax.random.normal(k2i, (40, obs_shape), jnp.float32)
    obs_o2 = jax.random.normal(k2o, (40, obs_shape), jnp.float32)
    out2 = jax.block_until_ready(
        utility_forward(obs_i2, obs_o2, params, tile_b=16,
                        matmul_dtype=jnp.float32))
    ref2 = _reference(obs_i2, obs_o2, params)
    assert out2.shape == (40, n_actions)
    assert jnp.allclose(out2, ref2, atol=1e-5, rtol=1e-5)

    print("KERNEL_OK")
</pallas_src>

<mosaic_0001>
module attributes {stable_mosaic.version = 11 : i64} {
  func.func @_utility_kernel(%arg0: i32, %arg1: memref<8x16xf32, #tpu.memory_space<vmem>>, %arg2: memref<8x16xf32, #tpu.memory_space<vmem>>, %arg3: memref<16x128xbf16, #tpu.memory_space<vmem>>, %arg4: memref<16x128xbf16, #tpu.memory_space<vmem>>, %arg5: memref<1x128xf32, #tpu.memory_space<vmem>>, %arg6: memref<128x128xbf16, #tpu.memory_space<vmem>>, %arg7: memref<1x128xf32, #tpu.memory_space<vmem>>, %arg8: memref<128x8xbf16, #tpu.memory_space<vmem>>, %arg9: memref<1x8xf32, #tpu.memory_space<vmem>>, %arg10: memref<8x8xf32, #tpu.memory_space<vmem>>) attributes {dimension_semantics = [#tpu.dimension_semantics<parallel>], iteration_bounds = array<i64: 1>, scalar_prefetch = 0 : i64, scratch_operands = 0 : i64, tpu.core_type = #tpu.core_type<tc>, window_params = [{transform_indices = @transform_0, window_bounds = array<i64: 8, 16>}, {transform_indices = @transform_1, window_bounds = array<i64: 8, 16>}, {pipeline_mode = #tpu.pipeline_mode<synchronous>, transform_indices = @transform_2, window_bounds = array<i64: 16, 128>}, {pipeline_mode = #tpu.pipeline_mode<synchronous>, transform_indices = @transform_3, window_bounds = array<i64: 16, 128>}, {pipeline_mode = #tpu.pipeline_mode<synchronous>, transform_indices = @transform_4, window_bounds = array<i64: 1, 128>}, {pipeline_mode = #tpu.pipeline_mode<synchronous>, transform_indices = @transform_5, window_bounds = array<i64: 128, 128>}, {pipeline_mode = #tpu.pipeline_mode<synchronous>, transform_indices = @transform_6, window_bounds = array<i64: 1, 128>}, {pipeline_mode = #tpu.pipeline_mode<synchronous>, transform_indices = @transform_7, window_bounds = array<i64: 128, 8>}, {pipeline_mode = #tpu.pipeline_mode<synchronous>, transform_indices = @transform_8, window_bounds = array<i64: 1, 8>}, {transform_indices = @transform_9, window_bounds = array<i64: 8, 8>}]} {
    %c0 = arith.constant 0 : index
    %c0_0 = arith.constant 0 : index
    %0 = vector.load %arg1[%c0, %c0_0] : memref<8x16xf32, #tpu.memory_space<vmem>>, vector<8x16xf32>
    %1 = arith.truncf %0 : vector<8x16xf32> to vector<8x16xbf16>
    %c0_1 = arith.constant 0 : index
    %c0_2 = arith.constant 0 : index
    %2 = vector.load %arg2[%c0_1, %c0_2] : memref<8x16xf32, #tpu.memory_space<vmem>>, vector<8x16xf32>
    %3 = arith.truncf %2 : vector<8x16xf32> to vector<8x16xbf16>
    %c0_3 = arith.constant 0 : index
    %c0_4 = arith.constant 0 : index
    %4 = vector.load %arg3[%c0_3, %c0_4] : memref<16x128xbf16, #tpu.memory_space<vmem>>, vector<16x128xbf16>
    %cst = arith.constant dense<0.000000e+00> : vector<8x128xf32>
    %5 = tpu.matmul %1, %4, %cst {dimension_numbers = #tpu.dot_dimension_numbers<[1], [0], [0], [1], [0, 0, 1, 1], [], []>} : vector<8x16xbf16>, vector<16x128xbf16>, vector<8x128xf32> -> vector<8x128xf32>
    %c0_5 = arith.constant 0 : index
    %c0_6 = arith.constant 0 : index
    %6 = vector.load %arg4[%c0_5, %c0_6] : memref<16x128xbf16, #tpu.memory_space<vmem>>, vector<16x128xbf16>
    %cst_7 = arith.constant dense<0.000000e+00> : vector<8x128xf32>
    %7 = tpu.matmul %3, %6, %cst_7 {dimension_numbers = #tpu.dot_dimension_numbers<[1], [0], [0], [1], [0, 0, 1, 1], [], []>} : vector<8x16xbf16>, vector<16x128xbf16>, vector<8x128xf32> -> vector<8x128xf32>
    %8 = arith.addf %5, %7 : vector<8x128xf32>
    %c0_8 = arith.constant 0 : index
    %c0_9 = arith.constant 0 : index
    %9 = vector.load %arg5[%c0_8, %c0_9] : memref<1x128xf32, #tpu.memory_space<vmem>>, vector<1x128xf32>
    %10 = vector.broadcast %9 : vector<1x128xf32> to vector<8x128xf32>
    %11 = arith.addf %8, %10 : vector<8x128xf32>
    %cst_10 = arith.constant 0.000000e+00 : f32
    %12 = vector.broadcast %cst_10 : f32 to vector<8x128xf32>
    %13 = arith.maximumf %11, %12 : vector<8x128xf32>
    %14 = arith.truncf %13 : vector<8x128xf32> to vector<8x128xbf16>
    %c0_11 = arith.constant 0 : index
    %c0_12 = arith.constant 0 : index
    %15 = vector.load %arg6[%c0_11, %c0_12] : memref<128x128xbf16, #tpu.memory_space<vmem>>, vector<128x128xbf16>
    %cst_13 = arith.constant dense<0.000000e+00> : vector<8x128xf32>
    %16 = tpu.matmul %14, %15, %cst_13 {dimension_numbers = #tpu.dot_dimension_numbers<[1], [0], [0], [1], [0, 0, 1, 1], [], []>} : vector<8x128xbf16>, vector<128x128xbf16>, vector<8x128xf32> -> vector<8x128xf32>
    %c0_14 = arith.constant 0 : index
    %c0_15 = arith.constant 0 : index
    %17 = vector.load %arg7[%c0_14, %c0_15] : memref<1x128xf32, #tpu.memory_space<vmem>>, vector<1x128xf32>
    %18 = vector.broadcast %17 : vector<1x128xf32> to vector<8x128xf32>
    %19 = arith.addf %16, %18 : vector<8x128xf32>
    %cst_16 = arith.constant 0.000000e+00 : f32
    %20 = vector.broadcast %cst_16 : f32 to vector<8x128xf32>
    %21 = arith.maximumf %19, %20 : vector<8x128xf32>
    %22 = arith.truncf %21 : vector<8x128xf32> to vector<8x128xbf16>
    %c0_17 = arith.constant 0 : index
    %c0_18 = arith.constant 0 : index
    %23 = vector.load %arg8[%c0_17, %c0_18] : memref<128x8xbf16, #tpu.memory_space<vmem>>, vector<128x8xbf16>
    %cst_19 = arith.constant dense<0.000000e+00> : vector<8x8xf32>
    %24 = tpu.matmul %22, %23, %cst_19 {dimension_numbers = #tpu.dot_dimension_numbers<[1], [0], [0], [1], [0, 0, 1, 1], [], []>} : vector<8x128xbf16>, vector<128x8xbf16>, vector<8x8xf32> -> vector<8x8xf32>
    %c0_20 = arith.constant 0 : index
    %c0_21 = arith.constant 0 : index
    %25 = vector.load %arg9[%c0_20, %c0_21] : memref<1x8xf32, #tpu.memory_space<vmem>>, vector<1x8xf32>
    %26 = vector.broadcast %25 : vector<1x8xf32> to vector<8x8xf32>
    %27 = arith.addf %24, %26 : vector<8x8xf32>
    %c0_22 = arith.constant 0 : index
    %c0_23 = arith.constant 0 : index
    %28 = vector.load %arg10[%c0_22, %c0_23] : memref<8x8xf32, #tpu.memory_space<vmem>>, vector<8x8xf32>
    tpu.vector_store %arg10[%c0_22, %c0_23], %27 {strides = array<i32>} : memref<8x8xf32, #tpu.memory_space<vmem>>, vector<8x8xf32>,
    return
  }
  func.func @transform_0(%arg0: i32) -> (i32, i32) {
    %c0_i32 = arith.constant 0 : i32
    %c0_i32_0 = arith.constant 0 : i32
    return %arg0, %c0_i32 : i32, i32
  }
  func.func @transform_1(%arg0: i32) -> (i32, i32) {
    %c0_i32 = arith.constant 0 : i32
    %c0_i32_0 = arith.constant 0 : i32
    return %arg0, %c0_i32 : i32, i32
  }
  func.func @transform_2(%arg0: i32) -> (i32, i32) {
    %c0_i32 = arith.constant 0 : i32
    %c0_i32_0 = arith.constant 0 : i32
    %c0_i32_1 = arith.constant 0 : i32
    return %c0_i32, %c0_i32_0 : i32, i32
  }
  func.func @transform_3(%arg0: i32) -> (i32, i32) {
    %c0_i32 = arith.constant 0 : i32
    %c0_i32_0 = arith.constant 0 : i32
    %c0_i32_1 = arith.constant 0 : i32
    return %c0_i32, %c0_i32_0 : i32, i32
  }
  func.func @transform_4(%arg0: i32) -> (i32, i32) {
    %c0_i32 = arith.constant 0 : i32
    %c0_i32_0 = arith.constant 0 : i32
    %c0_i32_1 = arith.constant 0 : i32
    return %c0_i32, %c0_i32_0 : i32, i32
  }
  func.func @transform_5(%arg0: i32) -> (i32, i32) {
    %c0_i32 = arith.constant 0 : i32
    %c0_i32_0 = arith.constant 0 : i32
    %c0_i32_1 = arith.constant 0 : i32
    return %c0_i32, %c0_i32_0 : i32, i32
  }
  func.func @transform_6(%arg0: i32) -> (i32, i32) {
    %c0_i32 = arith.constant 0 : i32
    %c0_i32_0 = arith.constant 0 : i32
    %c0_i32_1 = arith.constant 0 : i32
    return %c0_i32, %c0_i32_0 : i32, i32
  }
  func.func @transform_7(%arg0: i32) -> (i32, i32) {
    %c0_i32 = arith.constant 0 : i32
    %c0_i32_0 = arith.constant 0 : i32
    %c0_i32_1 = arith.constant 0 : i32
    return %c0_i32, %c0_i32_0 : i32, i32
  }
  func.func @transform_8(%arg0: i32) -> (i32, i32) {
    %c0_i32 = arith.constant 0 : i32
    %c0_i32_0 = arith.constant 0 : i32
    %c0_i32_1 = arith.constant 0 : i32
    return %c0_i32, %c0_i32_0 : i32, i32
  }
  func.func @transform_9(%arg0: i32) -> (i32, i32) {
    %c0_i32 = arith.constant 0 : i32
    %c0_i32_0 = arith.constant 0 : i32
    return %arg0, %c0_i32 : i32, i32
  }
}

</mosaic_0001>

<bundles_post_ra>
// kernel: tpu_custom_call.1
= control target key start
LH: loop header
LB: loop body
LE: loop exit
PB: predicated region body
PF: predicated region fallthrough
CT: control target
= control target key end

     0   :  { %14 = vsyncpa [#allocation3], 0  ;;  %s697_s0 = inlined_call_operand.hbm [shape: f32[8,16], index: 0, kind: input, shape index: {}]   ;;  %s698_s1 = inlined_call_operand.hbm [shape: f32[8,16], index: 1, kind: input, shape index: {}]   ;;  %s699_s2 = inlined_call_operand.hbm [shape: bf16[16,128], index: 2, kind: input, shape index: {}]   ;;  %s700_s3 = inlined_call_operand.hbm [shape: bf16[16,128], index: 3, kind: input, shape index: {}]   ;;  %s701_s4 = inlined_call_operand.vmem [shape: f32[1,128], index: 4, kind: input, shape index: {}]   ;;  %s702_s5 = inlined_call_operand.vmem [shape: bf16[128,128], index: 5, kind: input, shape index: {}]   ;;  %s703_s6 = inlined_call_operand.vmem [shape: f32[1,128], index: 6, kind: input, shape index: {}]   ;;  %s704_s7 = inlined_call_operand.vmem [shape: bf16[128,8], index: 7, kind: input, shape index: {}]   ;;  %s705_s8 = inlined_call_operand.vmem [shape: f32[1,8], index: 8, kind: input, shape index: {}]   ;;  %s706_s9 = inlined_call_operand.hbm [shape: f32[8,8], index: 9, kind: output, shape index: {}]  }
   0x1   :  { %15 = vsyncpa [#allocation6], 0 }
   0x2   :  { %16 = vsyncpa [#allocation9], 0  ;;  %s34_s11 = sshll.u32 %s698_s1, 4  ;;  %s35_s11 = int_to_ptr.hbm [resolvable:$true] %s34_s11 }
   0x3   :  { %17 = vsyncpa [#allocation4], 0  ;;  %s568_s12 = smov [#allocation5]   ;;  %s23_s16 = sshll.u32 %s697_s0, 4  ;;  %s24_s16 = int_to_ptr.hbm [resolvable:$true] %s23_s16 }
   0x4   :  { %s36_s13 = sshll.u32 %s568_s12, 4  ;;  %s569_s17 = smov [#allocation2]   ;;  %s37_s13 = int_to_ptr.vmem [resolvable:$true] %s36_s13 }
   0x5   :  { %39 = dma.hbm_to_vmem [thread:$0]  %s35_s11, 128, %s37_s13, [#allocation6]  }
   0x6   :  { %s25_s18 = sshll.u32 %s569_s17, 4  ;;  %s44_s21 = sshll.u32 %s699_s2, 4  ;;  %s26_s18 = int_to_ptr.vmem [resolvable:$true] %s25_s18  ;;  %s45_s21 = int_to_ptr.hbm [resolvable:$true] %s44_s21 }
   0x7   :  { %28 = dma.hbm_to_vmem [thread:$0]  %s24_s16, 128, %s26_s18, [#allocation3]  }
   0x8   :  { %s570_s1 = smov [#allocation7]   ;;  %s57_s25 = sshll.u32 %s700_s3, 4  ;;  %s58_s25 = int_to_ptr.hbm [resolvable:$true] %s57_s25 }
   0x9   :  { %s46_s22 = sshll.u32 %s570_s1, 4  ;;  %s571_s26 = smov 64   ;;  %s47_s22 = int_to_ptr.vmem [resolvable:$true] %s46_s22 }
   0xa   :  { %s572_s0 = smov 4   ;;  %s573_s27 = smov [#allocation8]  }
   0xb   :  { %52 = dma.hbm_to_vmem [thread:$0]  %s45_s21, 128, %s47_s22, [#allocation6], %s571_s26, %s571_s26, %s572_s0  }
   0xc   :  { %s59_s28 = sshll.u32 %s573_s27, 4  ;;  %s60_s28 = int_to_ptr.vmem [resolvable:$true] %s59_s28 }
   0xd   :  { %65 = dma.hbm_to_vmem [thread:$0]  %s58_s25, 128, %s60_s28, [#allocation9], %s571_s26, %s571_s26, %s572_s0  }
   0xe   :  { %560 = dma.done.wait [#allocation3], 128  }
   0xf   :  { %561 = vsyncadd [#allocation3], 4294967168 }
  0x10   :  { %562 = dma.done.wait [#allocation6], 256  }
  0x11   :  { %563 = vsyncadd [#allocation6], 4294967040 }
  0x12   :  { %564 = dma.done.wait [#allocation9], 128  }
  0x13   :  { %565 = vsyncadd [#allocation9], 4294967168  ;;  %v413_v0 = vld [vmem:[#allocation8] sm:$0xff]  ;;  %v412_v1 = vld [vmem:[#allocation7] sm:$0xff]  ;;  %vm107_vm0 = vcmask 130048   ;;  %s574_s17 = smov [#allocation10]  }
  0x14   :  { %v95_v2 = vld [vmem:[#allocation5] sm:$0xff]  ;;  %v93_v4 = vld [vmem:[#allocation2] sm:$0xff]  ;;  %v421_v5 = vld [vmem:[%s702_s5 + $0x38] sm:$0xff]  ;;  %118 = vmatpush.bf16.msra.mxu0 %v413_v0  ;;  %140 = vmatpush.bf16.msra.mxu1 %v412_v1  ;;  %s324_s18 = sshll.u32 %s574_s17, 4  ;;  %vm317_vm1 = vcmask 64512   ;;  %s325_s18 = int_to_ptr.vmem [resolvable:$true] %s324_s18 }
  0x15   :  { %v96_v3 = vpack.c.bf16 %v95_v2, %v95_v2  ;;  %v94_v6 = vpack.c.bf16 %v93_v4, %v93_v4  ;;  %221 = vmatpush.bf16.msra.mxu2 %v421_v5  ;;  %v420_v7 = vld [vmem:[%s702_s5 + $0x30] sm:$0xff]  ;;  %v419_v8 = vld [vmem:[%s702_s5 + $0x28] sm:$0xff]  ;;  %v418_v9 = vld [vmem:[%s702_s5 + $0x20] sm:$0xff] }
  0x16   :  { %v417_v10 = vld [vmem:[%s702_s5 + $0x18] sm:$0xff]  ;;  %v416_v11 = vld [vmem:[%s702_s5 + $0x10] sm:$0xff]  ;;  %v415_v12 = vld [vmem:[%s702_s5 + $0x8] sm:$0xff] }
  0x17   :  { %342 = vmatmul.msk.bf16.vlgmr.msra.gmra.mxu0 %vm107_vm0, %v96_v3  ;;  %347 = vmatmul.msk.bf16.vlgmr.msra.gmra.mxu1 %vm107_vm0, %v94_v6  ;;  %v414_v13 = vld [vmem:[%s702_s5] sm:$0xff]  ;;  %v429_v14 = vld [vmem:[%s704_s7 + $0x38] sm:$0xff]  ;;  %v428_v15 = vld [vmem:[%s704_s7 + $0x30] sm:$0xff] }
  0x18   :  { %304 = vmatpush.bf16.msra.mxu3 %v429_v14  ;;  %v427_v16 = vld [vmem:[%s704_s7 + $0x28] sm:$0xff]  ;;  %v426_v17 = vld [vmem:[%s704_s7 + $0x20] sm:$0xff]  ;;  %v425_v18 = vld [vmem:[%s704_s7 + $0x18] sm:$0xff] }
  0x19   :  { %222 = vmatpush.bf16.msra.mxu2 %v420_v7  ;;  %v424_v19 = vld [vmem:[%s704_s7 + $0x10] sm:$0xff]  ;;  %v437_v20 = vld [vmem:[%s701_s4] ss:$0 sm:$0xff]  ;;  %v423_v29 = vld [vmem:[%s704_s7 + $0x8] sm:$0xff] }
  0x1a   :  { %v422_v30 = vld [vmem:[%s704_s7] sm:$0xff]  ;;  %s326_s7 = sshll.u32 %s706_s9, 4  ;;  %s327_s7 = int_to_ptr.hbm [resolvable:$true] %s326_s7 }
  0x1b   :  { %v438_v31 = vld [vmem:[%s703_s6] ss:$0 sm:$0xff] }
  0x1c   :  { %305 = vmatpush.bf16.msra.mxu3 %v428_v15  ;;  %v439_v37 = vld [vmem:[%s705_s8] ss:$0 sm:$0xff] }
  0x1d   :  { %223 = vmatpush.bf16.msra.mxu2 %v419_v8 }
  0x20   :  { %306 = vmatpush.bf16.msra.mxu3 %v427_v16 }
  0x21   :  { %224 = vmatpush.bf16.msra.mxu2 %v418_v9 }
  0x24   :  { %307 = vmatpush.bf16.msra.mxu3 %v426_v17 }
  0x25   :  { %225 = vmatpush.bf16.msra.mxu2 %v417_v10 }
  0x28   :  { %308 = vmatpush.bf16.msra.mxu3 %v425_v18 }
  0x29   :  { %226 = vmatpush.bf16.msra.mxu2 %v416_v11 }
  0x2c   :  { %309 = vmatpush.bf16.msra.mxu3 %v424_v19 }
  0x2d   :  { %227 = vmatpush.bf16.msra.mxu2 %v415_v12 }
  0x30   :  { %310 = vmatpush.bf16.msra.mxu3 %v423_v29 }
  0x31   :  { %228 = vmatpush.bf16.msra.mxu2 %v414_v13 }
  0x34   :  { %311 = vmatpush.bf16.msra.mxu3 %v422_v30 }
  0x94   :  { %v120_v21 = vpop.f32.mrf.mxu0  ;;  %v142_v22 = vpop.f32.mrf.mxu1 }
  0x95   :  { %v143_v23 = vadd.f32 %v142_v22, %v120_v21 }
  0x97   :  { %v150_v24 = vadd.f32 %v437_v20, %v143_v23 }
  0x99   :  { %v151_v25 = vmax.f32 %v150_v24, 0.0 }
  0x9b   :  { %v152_v26 = vpack.c.bf16 %v151_v25, %v151_v25 }
  0x9c   :  { %v122_v27 = vpop.f32.mrf.mxu0  ;;  %v144_v28 = vpop.f32.mrf.mxu1 }
  0x9d   :  { %229 = vmatmul.bf16.vlgmr.msra.gmra.mxu2 %v152_v26 }
 0x120   :  { %v230_v32 = vpop.f32.mrf.mxu2 }
 0x121   :  { %v231_v33 = vadd.f32 %v438_v31, %v230_v32 }
 0x123   :  { %v234_v34 = vmax.f32 %v231_v33, 0.0 }
 0x125   :  { %v235_v35 = vpack.c.bf16 %v234_v34, %v234_v34 }
 0x127   :  { %312 = vmatmul.bf16.vlgmr.msra.gmra.mxu3 %v235_v35 }
 0x128   :  { %v232_v36 = vpop.f32.mrf.mxu2 }
 0x1aa   :  { %v313_v38 = vpop.f32.mrf.mxu3 }
 0x1ab   :  { %v314_v39 = vadd.f32 %v439_v37, %v313_v38 }
 0x1ad   :  { %318 = vst.msk [vmem:[#allocation10] sm:$0xff] %vm317_vm1, %v314_v39 }
 0x1ae   :  { %329 = dma.vmem_to_hbm [thread:$0]  %s325_s18, 128, %s327_s7, [#allocation4]  }
 0x1b2   :  { %v315_v40 = vpop.f32.mrf.mxu3 }
 0x1b3   :  { %566 = dma.done.wait [#allocation4], 128  }
 0x1b4   :  { %567 = vsyncadd [#allocation4], 4294967168 }
 0x1b5   :  { %334 = vsyncpa [#allocation3], 1 }
 0x1b6   :  { %335 = vsyncpa [#allocation6], 1 }
 0x1b7   :  { %336 = vsyncpa [#allocation9], 1 }
 0x1b8   :  { %337 = vsyncpa [#allocation4], 1 }

</bundles_post_ra>
